<compile_context>
chip_gen: v6e
topology: v6e:2x2x1
jax: 0.10.0
libtpu: 0.0.40
codegen_flags: <defaults>
</compile_context>

<pallas_src>
import functools

import jax
import jax.numpy as jnp
from jax.experimental import pallas as pl
from jax.experimental.pallas import tpu as pltpu


def _masked_mean_kernel(x_ref, m_ref, o_ref, *, K, F, G):
    # x_ref: (TM, G*K*F)   m_ref: (TM, G*K)   o_ref: (TM, G*F)
    m = m_ref[...].astype(jnp.float32)                      # tiny (TM, G*K)
    cols = []
    for g in range(G):
        base = g * K * F
        mg = m[:, g * K:(g + 1) * K]                         # (TM, K)
        # Masked sum over neighbors: slice the ref per neighbor (no full
        # upcast copy of the block), accumulate in f32.
        acc = x_ref[:, base:base + F].astype(jnp.float32) * mg[:, 0:1]
        for k in range(1, K):
            acc = acc + (x_ref[:, base + k * F:base + (k + 1) * F]
                         .astype(jnp.float32) * mg[:, k:k + 1])
        denom = jnp.sum(mg, axis=1, keepdims=True) + jnp.float32(1e-10)
        cols.append(acc / denom)
    out = cols[0] if G == 1 else jnp.concatenate(cols, axis=1)
    o_ref[...] = out.astype(o_ref.dtype)                     # one lane-dense store


def _mean_kernel(x_ref, o_ref, *, K, F, G):
    # x_ref: (TM, G*K*F)   o_ref: (TM, G*F)
    inv_k = jnp.float32(1.0 / K)
    cols = []
    for g in range(G):
        base = g * K * F
        acc = x_ref[:, base:base + F].astype(jnp.float32)
        for k in range(1, K):
            acc = acc + x_ref[:, base + k * F:base + (k + 1) * F].astype(jnp.float32)
        cols.append(acc * inv_k)
    out = cols[0] if G == 1 else jnp.concatenate(cols, axis=1)
    o_ref[...] = out.astype(o_ref.dtype)


def _pick_block_rows(m_rows, row_bytes, target_bytes):
    """Rows per grid step.

    * ~target_bytes per x block (double-buffered this stays well inside the
      scoped-VMEM defaults on v5e/v6e/v7x for the default 4 MiB target).
    * At least 2 (and an even number of) grid steps when there is enough work,
      so v7x's two TensorCores both get a balanced share.
    * Steps are near-equal (no tiny, poorly amortized tail block).
    """
    tm_target = max(1, target_bytes // max(row_bytes, 1))
    steps = -(-m_rows // tm_target)                          # ceil
    if m_rows > 16 and steps < 2:
        steps = 2                                            # v7x: span both TCs
    if steps > 1 and steps % 2 == 1:
        steps += 1                                           # keep step count even
    if steps <= 1:
        return int(m_rows)                                   # single full block
    tm = -(-m_rows // steps)                                 # balanced split
    tm = ((tm + 7) // 8) * 8                                 # sublane multiple of 8
    return int(min(tm, m_rows))


def mean_aggregator(neighbor_features, mask=None, *, block_rows=None,
                    target_block_bytes=4 * 1024 * 1024):
    """Pallas implementation of MeanAggregator.forward.

    neighbor_features: [B, N, K, F]
    mask (optional)  : [B, N, K]
    returns          : [B, N, F]
    """
    B, N, K, F = neighbor_features.shape
    M = B * N

    # Fold G rows into the lane dim so the output minor dim becomes 128.
    if F < 128 and 128 % F == 0:
        G = 128 // F
        if M % G != 0:
            G = 1
    else:
        G = 1
    Mg = M // G

    x = neighbor_features.reshape(Mg, G * K * F)   # contiguous -> free reshape
    itemsize = jnp.dtype(x.dtype).itemsize
    TM = (block_rows if block_rows is not None
          else _pick_block_rows(Mg, G * K * F * itemsize, target_block_bytes))
    grid = (pl.cdiv(Mg, TM),)
    cp = pltpu.CompilerParams(dimension_semantics=("parallel",))

    if mask is None:
        out = pl.pallas_call(
            functools.partial(_mean_kernel, K=K, F=F, G=G),
            out_shape=jax.ShapeDtypeStruct((Mg, G * F), x.dtype),
            grid=grid,
            in_specs=[pl.BlockSpec((TM, G * K * F), lambda i: (i, 0))],
            out_specs=pl.BlockSpec((TM, G * F), lambda i: (i, 0)),
            compiler_params=cp,
        )(x)
    else:
        m = mask.reshape(Mg, G * K)   # no wrapper astype; cast happens in-kernel
        out = pl.pallas_call(
            functools.partial(_masked_mean_kernel, K=K, F=F, G=G),
            out_shape=jax.ShapeDtypeStruct((Mg, G * F), x.dtype),
            grid=grid,
            in_specs=[
                pl.BlockSpec((TM, G * K * F), lambda i: (i, 0)),
                pl.BlockSpec((TM, G * K), lambda i: (i, 0)),
            ],
            out_specs=pl.BlockSpec((TM, G * F), lambda i: (i, 0)),
            compiler_params=cp,
        )(x, m)

    return out.reshape(B, N, F)


def _reference(neighbor_features, mask=None):
    # Pure-JAX reference mirroring the PyTorch semantics exactly.
    if mask is not None:
        m = mask[..., None].astype(neighbor_features.dtype)
        nf = neighbor_features * m
        return nf.sum(axis=2) / (m.sum(axis=2) + 1e-10)
    return neighbor_features.mean(axis=2)


if __name__ == "__main__":
    key = jax.random.PRNGKey(0)
    k1, k2, k3, k4 = jax.random.split(key, 4)

    # Small shapes consistent with the module.
    B, N, K, F = 2, 8, 8, 32
    neighbor_features = jax.random.normal(k1, (B, N, K, F), dtype=jnp.float32)
    mask = (jax.random.uniform(k2, (B, N, K)) > 0.3).astype(jnp.float32)

    # Masked path
    out_masked = mean_aggregator(neighbor_features, mask)
    jax.block_until_ready(out_masked)
    ref_masked = _reference(neighbor_features, mask)
    assert out_masked.shape == (B, N, F)
    assert jnp.allclose(out_masked, ref_masked, atol=1e-5, rtol=1e-5)

    # Unmasked path (plain mean over neighbors)
    out_plain = mean_aggregator(neighbor_features, None)
    jax.block_until_ready(out_plain)
    ref_plain = _reference(neighbor_features, None)
    assert out_plain.shape == (B, N, F)
    assert jnp.allclose(out_plain, ref_plain, atol=1e-5, rtol=1e-5)

    # Larger shape: exercises the multi-step grid (even, balanced blocks) and
    # the grouped lane-dense output path (M = 2400 -> Mg = 600, out lanes 128).
    B2, N2, K2, F2 = 4, 600, 8, 32
    nf2 = jax.random.normal(k3, (B2, N2, K2, F2), dtype=jnp.float32)
    mask2 = (jax.random.uniform(k4, (B2, N2, K2)) > 0.3).astype(jnp.float32)
    out2 = mean_aggregator(nf2, mask2)
    jax.block_until_ready(out2)
    ref2 = _reference(nf2, mask2)
    assert out2.shape == (B2, N2, F2)
    assert jnp.allclose(out2, ref2, atol=1e-5, rtol=1e-5)

    out2p = mean_aggregator(nf2, None)
    jax.block_until_ready(out2p)
    assert jnp.allclose(out2p, _reference(nf2, None), atol=1e-5, rtol=1e-5)

    # bf16 inputs: exercise the "slice the ref, upcast per neighbor" path.
    nf3 = nf2.astype(jnp.bfloat16)
    out3 = mean_aggregator(nf3, mask2)
    jax.block_until_ready(out3)
    ref3 = _reference(nf3, mask2.astype(jnp.float32))
    assert jnp.allclose(out3.astype(jnp.float32), ref3.astype(jnp.float32),
                        atol=3e-2, rtol=3e-2)

    print("KERNEL_OK")
</pallas_src>

<mosaic_0001>
module attributes {stable_mosaic.version = 11 : i64} {
  func.func @_masked_mean_kernel(%arg0: i32, %arg1: memref<4x1024xf32, #tpu.memory_space<vmem>>, %arg2: memref<4x32xf32, #tpu.memory_space<vmem>>, %arg3: memref<4x128xf32, #tpu.memory_space<vmem>>) attributes {dimension_semantics = [#tpu.dimension_semantics<parallel>], iteration_bounds = array<i64: 1>, scalar_prefetch = 0 : i64, scratch_operands = 0 : i64, tpu.core_type = #tpu.core_type<tc>, window_params = [{transform_indices = @transform_0, window_bounds = array<i64: 4, 1024>}, {transform_indices = @transform_1, window_bounds = array<i64: 4, 32>}, {transform_indices = @transform_2, window_bounds = array<i64: 4, 128>}]} {
    %c0 = arith.constant 0 : index
    %c0_0 = arith.constant 0 : index
    %0 = vector.load %arg2[%c0, %c0_0] : memref<4x32xf32, #tpu.memory_space<vmem>>, vector<4x32xf32>
    %1 = vector.extract_strided_slice %0 {offsets = [0, 0], sizes = [4, 8], strides = [1, 1]} : vector<4x32xf32> to vector<4x8xf32>
    %c0_1 = arith.constant 0 : index
    %c0_2 = arith.constant 0 : index
    %2 = vector.load %arg1[%c0_1, %c0_2] : memref<4x1024xf32, #tpu.memory_space<vmem>>, vector<4x32xf32>
    %3 = vector.extract_strided_slice %1 {offsets = [0, 0], sizes = [4, 1], strides = [1, 1]} : vector<4x8xf32> to vector<4x1xf32>
    %4 = vector.broadcast %3 : vector<4x1xf32> to vector<4x32xf32>
    %5 = arith.mulf %2, %4 : vector<4x32xf32>
    %c0_3 = arith.constant 0 : index
    %c32 = arith.constant 32 : index
    %6 = vector.load %arg1[%c0_3, %c32] : memref<4x1024xf32, #tpu.memory_space<vmem>>, vector<4x32xf32>
    %7 = vector.extract_strided_slice %1 {offsets = [0, 1], sizes = [4, 1], strides = [1, 1]} : vector<4x8xf32> to vector<4x1xf32>
    %8 = vector.broadcast %7 : vector<4x1xf32> to vector<4x32xf32>
    %9 = arith.mulf %6, %8 : vector<4x32xf32>
    %10 = arith.addf %5, %9 : vector<4x32xf32>
    %c0_4 = arith.constant 0 : index
    %c64 = arith.constant 64 : index
    %11 = vector.load %arg1[%c0_4, %c64] : memref<4x1024xf32, #tpu.memory_space<vmem>>, vector<4x32xf32>
    %12 = vector.extract_strided_slice %1 {offsets = [0, 2], sizes = [4, 1], strides = [1, 1]} : vector<4x8xf32> to vector<4x1xf32>
    %13 = vector.broadcast %12 : vector<4x1xf32> to vector<4x32xf32>
    %14 = arith.mulf %11, %13 : vector<4x32xf32>
    %15 = arith.addf %10, %14 : vector<4x32xf32>
    %c0_5 = arith.constant 0 : index
    %c96 = arith.constant 96 : index
    %16 = vector.load %arg1[%c0_5, %c96] : memref<4x1024xf32, #tpu.memory_space<vmem>>, vector<4x32xf32>
    %17 = vector.extract_strided_slice %1 {offsets = [0, 3], sizes = [4, 1], strides = [1, 1]} : vector<4x8xf32> to vector<4x1xf32>
    %18 = vector.broadcast %17 : vector<4x1xf32> to vector<4x32xf32>
    %19 = arith.mulf %16, %18 : vector<4x32xf32>
    %20 = arith.addf %15, %19 : vector<4x32xf32>
    %c0_6 = arith.constant 0 : index
    %c128 = arith.constant 128 : index
    %21 = vector.load %arg1[%c0_6, %c128] : memref<4x1024xf32, #tpu.memory_space<vmem>>, vector<4x32xf32>
    %22 = vector.extract_strided_slice %1 {offsets = [0, 4], sizes = [4, 1], strides = [1, 1]} : vector<4x8xf32> to vector<4x1xf32>
    %23 = vector.broadcast %22 : vector<4x1xf32> to vector<4x32xf32>
    %24 = arith.mulf %21, %23 : vector<4x32xf32>
    %25 = arith.addf %20, %24 : vector<4x32xf32>
    %c0_7 = arith.constant 0 : index
    %c160 = arith.constant 160 : index
    %26 = vector.load %arg1[%c0_7, %c160] : memref<4x1024xf32, #tpu.memory_space<vmem>>, vector<4x32xf32>
    %27 = vector.extract_strided_slice %1 {offsets = [0, 5], sizes = [4, 1], strides = [1, 1]} : vector<4x8xf32> to vector<4x1xf32>
    %28 = vector.broadcast %27 : vector<4x1xf32> to vector<4x32xf32>
    %29 = arith.mulf %26, %28 : vector<4x32xf32>
    %30 = arith.addf %25, %29 : vector<4x32xf32>
    %c0_8 = arith.constant 0 : index
    %c192 = arith.constant 192 : index
    %31 = vector.load %arg1[%c0_8, %c192] : memref<4x1024xf32, #tpu.memory_space<vmem>>, vector<4x32xf32>
    %32 = vector.extract_strided_slice %1 {offsets = [0, 6], sizes = [4, 1], strides = [1, 1]} : vector<4x8xf32> to vector<4x1xf32>
    %33 = vector.broadcast %32 : vector<4x1xf32> to vector<4x32xf32>
    %34 = arith.mulf %31, %33 : vector<4x32xf32>
    %35 = arith.addf %30, %34 : vector<4x32xf32>
    %c0_9 = arith.constant 0 : index
    %c224 = arith.constant 224 : index
    %36 = vector.load %arg1[%c0_9, %c224] : memref<4x1024xf32, #tpu.memory_space<vmem>>, vector<4x32xf32>
    %37 = vector.extract_strided_slice %1 {offsets = [0, 7], sizes = [4, 1], strides = [1, 1]} : vector<4x8xf32> to vector<4x1xf32>
    %38 = vector.broadcast %37 : vector<4x1xf32> to vector<4x32xf32>
    %39 = arith.mulf %36, %38 : vector<4x32xf32>
    %40 = arith.addf %35, %39 : vector<4x32xf32>
    %cst = arith.constant dense<0.000000e+00> : vector<4xf32>
    %41 = vector.multi_reduction <add>, %1, %cst [1] : vector<4x8xf32> to vector<4xf32>
    %42 = vector.shape_cast %41 : vector<4xf32> to vector<4x1xf32>
    %cst_10 = arith.constant 1.000000e-10 : f32
    %43 = vector.broadcast %cst_10 : f32 to vector<4x1xf32>
    %44 = arith.addf %42, %43 : vector<4x1xf32>
    %45 = vector.broadcast %44 : vector<4x1xf32> to vector<4x32xf32>
    %46 = arith.divf %40, %45 : vector<4x32xf32>
    %47 = vector.extract_strided_slice %0 {offsets = [0, 8], sizes = [4, 8], strides = [1, 1]} : vector<4x32xf32> to vector<4x8xf32>
    %c0_11 = arith.constant 0 : index
    %c256 = arith.constant 256 : index
    %48 = vector.load %arg1[%c0_11, %c256] : memref<4x1024xf32, #tpu.memory_space<vmem>>, vector<4x32xf32>
    %49 = vector.extract_strided_slice %47 {offsets = [0, 0], sizes = [4, 1], strides = [1, 1]} : vector<4x8xf32> to vector<4x1xf32>
    %50 = vector.broadcast %49 : vector<4x1xf32> to vector<4x32xf32>
    %51 = arith.mulf %48, %50 : vector<4x32xf32>
    %c0_12 = arith.constant 0 : index
    %c288 = arith.constant 288 : index
    %52 = vector.load %arg1[%c0_12, %c288] : memref<4x1024xf32, #tpu.memory_space<vmem>>, vector<4x32xf32>
    %53 = vector.extract_strided_slice %47 {offsets = [0, 1], sizes = [4, 1], strides = [1, 1]} : vector<4x8xf32> to vector<4x1xf32>
    %54 = vector.broadcast %53 : vector<4x1xf32> to vector<4x32xf32>
    %55 = arith.mulf %52, %54 : vector<4x32xf32>
    %56 = arith.addf %51, %55 : vector<4x32xf32>
    %c0_13 = arith.constant 0 : index
    %c320 = arith.constant 320 : index
    %57 = vector.load %arg1[%c0_13, %c320] : memref<4x1024xf32, #tpu.memory_space<vmem>>, vector<4x32xf32>
    %58 = vector.extract_strided_slice %47 {offsets = [0, 2], sizes = [4, 1], strides = [1, 1]} : vector<4x8xf32> to vector<4x1xf32>
    %59 = vector.broadcast %58 : vector<4x1xf32> to vector<4x32xf32>
    %60 = arith.mulf %57, %59 : vector<4x32xf32>
    %61 = arith.addf %56, %60 : vector<4x32xf32>
    %c0_14 = arith.constant 0 : index
    %c352 = arith.constant 352 : index
    %62 = vector.load %arg1[%c0_14, %c352] : memref<4x1024xf32, #tpu.memory_space<vmem>>, vector<4x32xf32>
    %63 = vector.extract_strided_slice %47 {offsets = [0, 3], sizes = [4, 1], strides = [1, 1]} : vector<4x8xf32> to vector<4x1xf32>
    %64 = vector.broadcast %63 : vector<4x1xf32> to vector<4x32xf32>
    %65 = arith.mulf %62, %64 : vector<4x32xf32>
    %66 = arith.addf %61, %65 : vector<4x32xf32>
    %c0_15 = arith.constant 0 : index
    %c384 = arith.constant 384 : index
    %67 = vector.load %arg1[%c0_15, %c384] : memref<4x1024xf32, #tpu.memory_space<vmem>>, vector<4x32xf32>
    %68 = vector.extract_strided_slice %47 {offsets = [0, 4], sizes = [4, 1], strides = [1, 1]} : vector<4x8xf32> to vector<4x1xf32>
    %69 = vector.broadcast %68 : vector<4x1xf32> to vector<4x32xf32>
    %70 = arith.mulf %67, %69 : vector<4x32xf32>
    %71 = arith.addf %66, %70 : vector<4x32xf32>
    %c0_16 = arith.constant 0 : index
    %c416 = arith.constant 416 : index
    %72 = vector.load %arg1[%c0_16, %c416] : memref<4x1024xf32, #tpu.memory_space<vmem>>, vector<4x32xf32>
    %73 = vector.extract_strided_slice %47 {offsets = [0, 5], sizes = [4, 1], strides = [1, 1]} : vector<4x8xf32> to vector<4x1xf32>
    %74 = vector.broadcast %73 : vector<4x1xf32> to vector<4x32xf32>
    %75 = arith.mulf %72, %74 : vector<4x32xf32>
    %76 = arith.addf %71, %75 : vector<4x32xf32>
    %c0_17 = arith.constant 0 : index
    %c448 = arith.constant 448 : index
    %77 = vector.load %arg1[%c0_17, %c448] : memref<4x1024xf32, #tpu.memory_space<vmem>>, vector<4x32xf32>
    %78 = vector.extract_strided_slice %47 {offsets = [0, 6], sizes = [4, 1], strides = [1, 1]} : vector<4x8xf32> to vector<4x1xf32>
    %79 = vector.broadcast %78 : vector<4x1xf32> to vector<4x32xf32>
    %80 = arith.mulf %77, %79 : vector<4x32xf32>
    %81 = arith.addf %76, %80 : vector<4x32xf32>
    %c0_18 = arith.constant 0 : index
    %c480 = arith.constant 480 : index
    %82 = vector.load %arg1[%c0_18, %c480] : memref<4x1024xf32, #tpu.memory_space<vmem>>, vector<4x32xf32>
    %83 = vector.extract_strided_slice %47 {offsets = [0, 7], sizes = [4, 1], strides = [1, 1]} : vector<4x8xf32> to vector<4x1xf32>
    %84 = vector.broadcast %83 : vector<4x1xf32> to vector<4x32xf32>
    %85 = arith.mulf %82, %84 : vector<4x32xf32>
    %86 = arith.addf %81, %85 : vector<4x32xf32>
    %cst_19 = arith.constant dense<0.000000e+00> : vector<4xf32>
    %87 = vector.multi_reduction <add>, %47, %cst_19 [1] : vector<4x8xf32> to vector<4xf32>
    %88 = vector.shape_cast %87 : vector<4xf32> to vector<4x1xf32>
    %cst_20 = arith.constant 1.000000e-10 : f32
    %89 = vector.broadcast %cst_20 : f32 to vector<4x1xf32>
    %90 = arith.addf %88, %89 : vector<4x1xf32>
    %91 = vector.broadcast %90 : vector<4x1xf32> to vector<4x32xf32>
    %92 = arith.divf %86, %91 : vector<4x32xf32>
    %93 = vector.extract_strided_slice %0 {offsets = [0, 16], sizes = [4, 8], strides = [1, 1]} : vector<4x32xf32> to vector<4x8xf32>
    %c0_21 = arith.constant 0 : index
    %c512 = arith.constant 512 : index
    %94 = vector.load %arg1[%c0_21, %c512] : memref<4x1024xf32, #tpu.memory_space<vmem>>, vector<4x32xf32>
    %95 = vector.extract_strided_slice %93 {offsets = [0, 0], sizes = [4, 1], strides = [1, 1]} : vector<4x8xf32> to vector<4x1xf32>
    %96 = vector.broadcast %95 : vector<4x1xf32> to vector<4x32xf32>
    %97 = arith.mulf %94, %96 : vector<4x32xf32>
    %c0_22 = arith.constant 0 : index
    %c544 = arith.constant 544 : index
    %98 = vector.load %arg1[%c0_22, %c544] : memref<4x1024xf32, #tpu.memory_space<vmem>>, vector<4x32xf32>
    %99 = vector.extract_strided_slice %93 {offsets = [0, 1], sizes = [4, 1], strides = [1, 1]} : vector<4x8xf32> to vector<4x1xf32>
    %100 = vector.broadcast %99 : vector<4x1xf32> to vector<4x32xf32>
    %101 = arith.mulf %98, %100 : vector<4x32xf32>
    %102 = arith.addf %97, %101 : vector<4x32xf32>
    %c0_23 = arith.constant 0 : index
    %c576 = arith.constant 576 : index
    %103 = vector.load %arg1[%c0_23, %c576] : memref<4x1024xf32, #tpu.memory_space<vmem>>, vector<4x32xf32>
    %104 = vector.extract_strided_slice %93 {offsets = [0, 2], sizes = [4, 1], strides = [1, 1]} : vector<4x8xf32> to vector<4x1xf32>
    %105 = vector.broadcast %104 : vector<4x1xf32> to vector<4x32xf32>
    %106 = arith.mulf %103, %105 : vector<4x32xf32>
    %107 = arith.addf %102, %106 : vector<4x32xf32>
    %c0_24 = arith.constant 0 : index
    %c608 = arith.constant 608 : index
    %108 = vector.load %arg1[%c0_24, %c608] : memref<4x1024xf32, #tpu.memory_space<vmem>>, vector<4x32xf32>
    %109 = vector.extract_strided_slice %93 {offsets = [0, 3], sizes = [4, 1], strides = [1, 1]} : vector<4x8xf32> to vector<4x1xf32>
    %110 = vector.broadcast %109 : vector<4x1xf32> to vector<4x32xf32>
    %111 = arith.mulf %108, %110 : vector<4x32xf32>
    %112 = arith.addf %107, %111 : vector<4x32xf32>
    %c0_25 = arith.constant 0 : index
    %c640 = arith.constant 640 : index
    %113 = vector.load %arg1[%c0_25, %c640] : memref<4x1024xf32, #tpu.memory_space<vmem>>, vector<4x32xf32>
    %114 = vector.extract_strided_slice %93 {offsets = [0, 4], sizes = [4, 1], strides = [1, 1]} : vector<4x8xf32> to vector<4x1xf32>
    %115 = vector.broadcast %114 : vector<4x1xf32> to vector<4x32xf32>
    %116 = arith.mulf %113, %115 : vector<4x32xf32>
    %117 = arith.addf %112, %116 : vector<4x32xf32>
    %c0_26 = arith.constant 0 : index
    %c672 = arith.constant 672 : index
    %118 = vector.load %arg1[%c0_26, %c672] : memref<4x1024xf32, #tpu.memory_space<vmem>>, vector<4x32xf32>
    %119 = vector.extract_strided_slice %93 {offsets = [0, 5], sizes = [4, 1], strides = [1, 1]} : vector<4x8xf32> to vector<4x1xf32>
    %120 = vector.broadcast %119 : vector<4x1xf32> to vector<4x32xf32>
    %121 = arith.mulf %118, %120 : vector<4x32xf32>
    %122 = arith.addf %117, %121 : vector<4x32xf32>
    %c0_27 = arith.constant 0 : index
    %c704 = arith.constant 704 : index
    %123 = vector.load %arg1[%c0_27, %c704] : memref<4x1024xf32, #tpu.memory_space<vmem>>, vector<4x32xf32>
    %124 = vector.extract_strided_slice %93 {offsets = [0, 6], sizes = [4, 1], strides = [1, 1]} : vector<4x8xf32> to vector<4x1xf32>
    %125 = vector.broadcast %124 : vector<4x1xf32> to vector<4x32xf32>
    %126 = arith.mulf %123, %125 : vector<4x32xf32>
    %127 = arith.addf %122, %126 : vector<4x32xf32>
    %c0_28 = arith.constant 0 : index
    %c736 = arith.constant 736 : index
    %128 = vector.load %arg1[%c0_28, %c736] : memref<4x1024xf32, #tpu.memory_space<vmem>>, vector<4x32xf32>
    %129 = vector.extract_strided_slice %93 {offsets = [0, 7], sizes = [4, 1], strides = [1, 1]} : vector<4x8xf32> to vector<4x1xf32>
    %130 = vector.broadcast %129 : vector<4x1xf32> to vector<4x32xf32>
    %131 = arith.mulf %128, %130 : vector<4x32xf32>
    %132 = arith.addf %127, %131 : vector<4x32xf32>
    %cst_29 = arith.constant dense<0.000000e+00> : vector<4xf32>
    %133 = vector.multi_reduction <add>, %93, %cst_29 [1] : vector<4x8xf32> to vector<4xf32>
    %134 = vector.shape_cast %133 : vector<4xf32> to vector<4x1xf32>
    %cst_30 = arith.constant 1.000000e-10 : f32
    %135 = vector.broadcast %cst_30 : f32 to vector<4x1xf32>
    %136 = arith.addf %134, %135 : vector<4x1xf32>
    %137 = vector.broadcast %136 : vector<4x1xf32> to vector<4x32xf32>
    %138 = arith.divf %132, %137 : vector<4x32xf32>
    %139 = vector.extract_strided_slice %0 {offsets = [0, 24], sizes = [4, 8], strides = [1, 1]} : vector<4x32xf32> to vector<4x8xf32>
    %c0_31 = arith.constant 0 : index
    %c768 = arith.constant 768 : index
    %140 = vector.load %arg1[%c0_31, %c768] : memref<4x1024xf32, #tpu.memory_space<vmem>>, vector<4x32xf32>
    %141 = vector.extract_strided_slice %139 {offsets = [0, 0], sizes = [4, 1], strides = [1, 1]} : vector<4x8xf32> to vector<4x1xf32>
    %142 = vector.broadcast %141 : vector<4x1xf32> to vector<4x32xf32>
    %143 = arith.mulf %140, %142 : vector<4x32xf32>
    %c0_32 = arith.constant 0 : index
    %c800 = arith.constant 800 : index
    %144 = vector.load %arg1[%c0_32, %c800] : memref<4x1024xf32, #tpu.memory_space<vmem>>, vector<4x32xf32>
    %145 = vector.extract_strided_slice %139 {offsets = [0, 1], sizes = [4, 1], strides = [1, 1]} : vector<4x8xf32> to vector<4x1xf32>
    %146 = vector.broadcast %145 : vector<4x1xf32> to vector<4x32xf32>
    %147 = arith.mulf %144, %146 : vector<4x32xf32>
    %148 = arith.addf %143, %147 : vector<4x32xf32>
    %c0_33 = arith.constant 0 : index
    %c832 = arith.constant 832 : index
    %149 = vector.load %arg1[%c0_33, %c832] : memref<4x1024xf32, #tpu.memory_space<vmem>>, vector<4x32xf32>
    %150 = vector.extract_strided_slice %139 {offsets = [0, 2], sizes = [4, 1], strides = [1, 1]} : vector<4x8xf32> to vector<4x1xf32>
    %151 = vector.broadcast %150 : vector<4x1xf32> to vector<4x32xf32>
    %152 = arith.mulf %149, %151 : vector<4x32xf32>
    %153 = arith.addf %148, %152 : vector<4x32xf32>
    %c0_34 = arith.constant 0 : index
    %c864 = arith.constant 864 : index
    %154 = vector.load %arg1[%c0_34, %c864] : memref<4x1024xf32, #tpu.memory_space<vmem>>, vector<4x32xf32>
    %155 = vector.extract_strided_slice %139 {offsets = [0, 3], sizes = [4, 1], strides = [1, 1]} : vector<4x8xf32> to vector<4x1xf32>
    %156 = vector.broadcast %155 : vector<4x1xf32> to vector<4x32xf32>
    %157 = arith.mulf %154, %156 : vector<4x32xf32>
    %158 = arith.addf %153, %157 : vector<4x32xf32>
    %c0_35 = arith.constant 0 : index
    %c896 = arith.constant 896 : index
    %159 = vector.load %arg1[%c0_35, %c896] : memref<4x1024xf32, #tpu.memory_space<vmem>>, vector<4x32xf32>
    %160 = vector.extract_strided_slice %139 {offsets = [0, 4], sizes = [4, 1], strides = [1, 1]} : vector<4x8xf32> to vector<4x1xf32>
    %161 = vector.broadcast %160 : vector<4x1xf32> to vector<4x32xf32>
    %162 = arith.mulf %159, %161 : vector<4x32xf32>
    %163 = arith.addf %158, %162 : vector<4x32xf32>
    %c0_36 = arith.constant 0 : index
    %c928 = arith.constant 928 : index
    %164 = vector.load %arg1[%c0_36, %c928] : memref<4x1024xf32, #tpu.memory_space<vmem>>, vector<4x32xf32>
    %165 = vector.extract_strided_slice %139 {offsets = [0, 5], sizes = [4, 1], strides = [1, 1]} : vector<4x8xf32> to vector<4x1xf32>
    %166 = vector.broadcast %165 : vector<4x1xf32> to vector<4x32xf32>
    %167 = arith.mulf %164, %166 : vector<4x32xf32>
    %168 = arith.addf %163, %167 : vector<4x32xf32>
    %c0_37 = arith.constant 0 : index
    %c960 = arith.constant 960 : index
    %169 = vector.load %arg1[%c0_37, %c960] : memref<4x1024xf32, #tpu.memory_space<vmem>>, vector<4x32xf32>
    %170 = vector.extract_strided_slice %139 {offsets = [0, 6], sizes = [4, 1], strides = [1, 1]} : vector<4x8xf32> to vector<4x1xf32>
    %171 = vector.broadcast %170 : vector<4x1xf32> to vector<4x32xf32>
    %172 = arith.mulf %169, %171 : vector<4x32xf32>
    %173 = arith.addf %168, %172 : vector<4x32xf32>
    %c0_38 = arith.constant 0 : index
    %c992 = arith.constant 992 : index
    %174 = vector.load %arg1[%c0_38, %c992] : memref<4x1024xf32, #tpu.memory_space<vmem>>, vector<4x32xf32>
    %175 = vector.extract_strided_slice %139 {offsets = [0, 7], sizes = [4, 1], strides = [1, 1]} : vector<4x8xf32> to vector<4x1xf32>
    %176 = vector.broadcast %175 : vector<4x1xf32> to vector<4x32xf32>
    %177 = arith.mulf %174, %176 : vector<4x32xf32>
    %178 = arith.addf %173, %177 : vector<4x32xf32>
    %cst_39 = arith.constant dense<0.000000e+00> : vector<4xf32>
    %179 = vector.multi_reduction <add>, %139, %cst_39 [1] : vector<4x8xf32> to vector<4xf32>
    %180 = vector.shape_cast %179 : vector<4xf32> to vector<4x1xf32>
    %cst_40 = arith.constant 1.000000e-10 : f32
    %181 = vector.broadcast %cst_40 : f32 to vector<4x1xf32>
    %182 = arith.addf %180, %181 : vector<4x1xf32>
    %183 = vector.broadcast %182 : vector<4x1xf32> to vector<4x32xf32>
    %184 = arith.divf %178, %183 : vector<4x32xf32>
    %185 = tpu.concatenate %46, %92, %138, %184 in 1 : vector<4x32xf32>, vector<4x32xf32>, vector<4x32xf32>, vector<4x32xf32> -> vector<4x128xf32>
    %c0_41 = arith.constant 0 : index
    %c0_42 = arith.constant 0 : index
    %186 = vector.load %arg3[%c0_41, %c0_42] : memref<4x128xf32, #tpu.memory_space<vmem>>, vector<4x128xf32>
    tpu.vector_store %arg3[%c0_41, %c0_42], %185 {strides = array<i32>} : memref<4x128xf32, #tpu.memory_space<vmem>>, vector<4x128xf32>,
    return
  }
  func.func @transform_0(%arg0: i32) -> (i32, i32) {
    %c0_i32 = arith.constant 0 : i32
    %c0_i32_0 = arith.constant 0 : i32
    return %arg0, %c0_i32 : i32, i32
  }
  func.func @transform_1(%arg0: i32) -> (i32, i32) {
    %c0_i32 = arith.constant 0 : i32
    %c0_i32_0 = arith.constant 0 : i32
    return %arg0, %c0_i32 : i32, i32
  }
  func.func @transform_2(%arg0: i32) -> (i32, i32) {
    %c0_i32 = arith.constant 0 : i32
    %c0_i32_0 = arith.constant 0 : i32
    return %arg0, %c0_i32 : i32, i32
  }
}

</mosaic_0001>

<bundles_post_ra>
// kernel: tpu_custom_call.1
= control target key start
LH: loop header
LB: loop body
LE: loop exit
PB: predicated region body
PF: predicated region fallthrough
CT: control target
= control target key end

     0   :  { %7 = vsyncpa [#allocation3], 0  ;;  %s728_s0 = inlined_call_operand.hbm [shape: f32[4,1024], index: 0, kind: input, shape index: {}]   ;;  %s729_s1 = inlined_call_operand.hbm [shape: f32[4,32], index: 1, kind: input, shape index: {}]   ;;  %s730_s2 = inlined_call_operand.hbm [shape: f32[4,128], index: 2, kind: output, shape index: {}]  }
   0x1   :  { %8 = vsyncpa [#allocation6], 0 }
   0x2   :  { %9 = vsyncpa [#allocation4], 0  ;;  %s547_s9 = smov [#allocation2]   ;;  %s548_s11 = smov [#allocation5]  }
   0x3   :  { %s16_s10 = sshll.u32 %s547_s9, 4  ;;  %s26_s12 = sshll.u32 %s548_s11, 4  ;;  %s17_s10 = int_to_ptr.vmem [resolvable:$true] %s16_s10  ;;  %s27_s12 = int_to_ptr.vmem [resolvable:$true] %s26_s12 }
   0x4   :  { %s489_s13 = scalar_lea.vmem %s17_s10, 512  ;;  %p494_p1 = scmp.lt.s32.totalorder %s17_s10, %s17_s10 }
   0x5   :  { %p490_p0 = scmp.ne.s32.totalorder %s17_s10, %s489_s13  ;;  %p495_p2 = scmp.lt.s32.totalorder %s489_s13, %s489_s13 }
   0x7   :  { %p496_p3 = por %p495_p2, %p494_p1 }
   0x9   :  { %p497_p4 = pnand %p496_p3, %p490_p0 }
   0xb   :  { %500 = shalt.err (!%p497_p4)
}
   0xc   :  { %19 = dma.hbm_to_vmem [thread:$0]  %s728_s0, 512, %s17_s10, [#allocation3]  }
   0xd   :  { %s509_s16 = scalar_lea.vmem %s27_s12, 64  ;;  %p514_p6 = scmp.lt.s32.totalorder %s27_s12, %s27_s12 }
   0xe   :  { %p510_p5 = scmp.ne.s32.totalorder %s27_s12, %s509_s16  ;;  %p515_p7 = scmp.lt.s32.totalorder %s509_s16, %s509_s16 }
  0x10   :  { %p516_p8 = por %p515_p7, %p514_p6 }
  0x12   :  { %p517_p9 = pnand %p516_p8, %p510_p5 }
  0x14   :  { %520 = shalt.err (!%p517_p9)
}
  0x15   :  { %29 = dma.hbm_to_vmem [thread:$0]  %s729_s1, 64, %s27_s12, [#allocation6]  }
  0x16   :  { %541 = dma.done.wait [#allocation3], 512  }
  0x17   :  { %542 = vsyncadd [#allocation3], 4294966784 }
  0x18   :  { %543 = dma.done.wait [#allocation6], 64  }
  0x19   :  { %544 = vsyncadd [#allocation6], 4294967232  ;;  %v549_v0 = vmov 0   ;;  %v550_v1 = vmov 2   ;;  %v609_v2 = vld [vmem:[#allocation5] sm:$0xf] }
  0x1a   :  { %440 = vset.pattern.permute.xlu0 %v549_v0  ;;  %442 = vset.pattern.permute.xlu1 %v550_v1  ;;  %v551_v3 = vmov 1   ;;  %v552_v4 = vmov 4   ;;  %v553_v5 = vmov 3   ;;  %v554_v6 = vmov 6   ;;  %s564_s0 = smov 104   ;;  %s569_s1 = smov 120  }
  0x1b   :  { %40 = vperm.xlu0 %440, %v609_v2   ;;  %55 = vperm.xlu1 %442, %v609_v2   ;;  %v555_v7 = vmov 5   ;;  %v556_v8 = vmov 7   ;;  %v557_v9 = vmov 8   ;;  %v558_v10 = vmov 25   ;;  %s570_s19 = smov 112   ;;  %s582_s20 = smov 96  }
  0x1c   :  { %v559_v11 = vmov 9   ;;  %v560_v12 = vmov 10   ;;  %v561_v13 = vmov 11   ;;  %v562_v14 = vmov 12   ;;  %v37_v32 = vld [vmem:[#allocation2] sm:$0xf] }
  0x1d   :  { %v563_v15 = vmov 13   ;;  %vm111_vm0 = vcmask 60416   ;;  %v565_v17 = vmov 17   ;;  %v566_v18 = vmov 26   ;;  %v74_v37 = vld [vmem:[#allocation2 + $0x4] sm:$0xf] }
  0x1e   :  { %v112_v16 = vsel %vm111_vm0, %v609_v2, 0.0  ;;  %v567_v19 = vmov 21   ;;  %v568_v20 = vmov 22   ;;  %v571_v21 = vmov 23   ;;  %s583_s21 = smov 64   ;;  %s584_s22 = smov 32  }
  0x1f   :  { %441 = vset.pattern.permute.xlu0 %v551_v3  ;;  %444 = vset.pattern.permute.xlu1 %v552_v4  ;;  %v572_v22 = vmov 18   ;;  %v573_v23 = vmov 19   ;;  %v574_v24 = vmov 27   ;;  %v575_v25 = vmov 14   ;;  %v118_v50 = vld [vmem:[#allocation2 + $0x8] sm:$0xf] }
  0x20   :  { %45 = vperm.xlu0 %441, %v609_v2   ;;  %76 = vperm.xlu1 %444, %v609_v2   ;;  %v576_v26 = vmov 29   ;;  %v577_v27 = vmov 15   ;;  %v578_v28 = vmov 30   ;;  %v579_v29 = vmov 24   ;;  %v662_v60 = vld [vmem:[#allocation2 + $0xc] sm:$0xf] }
  0x21   :  { %v580_v30 = vmov 31   ;;  %v581_v31 = vmov 16   ;;  %vm376_vm1 = vcmask 261120   ;;  %vm378_vm2 = vcmask 523264   ;;  %s587_s23 = smov [#allocation7]  }
  0x22   :  { %s389_s24 = sshll.u32 %s587_s23, 4  ;;  %vm380_vm3 = vcmask 785408   ;;  %s390_s24 = int_to_ptr.vmem [resolvable:$true] %s389_s24 }
  0x23   :  { %s521_s25 = scalar_lea.vmem %s390_s24, 64  ;;  %p526_p11 = scmp.lt.s32.totalorder %s390_s24, %s390_s24 }
  0x24   :  { %443 = vset.pattern.permute.xlu0 %v553_v5  ;;  %446 = vset.pattern.permute.xlu1 %v554_v6  ;;  %p522_p10 = scmp.ne.s32.totalorder %s390_s24, %s521_s25  ;;  %p527_p12 = scmp.lt.s32.totalorder %s521_s25, %s521_s25 }
  0x25   :  { %65 = vperm.xlu0 %443, %v609_v2   ;;  %92 = vperm.xlu1 %446, %v609_v2  }
  0x26   :  { %p528_p13 = por %p527_p12, %p526_p11 }
  0x28   :  { %p529_p0 = pnand %p528_p13, %p522_p10 }
  0x29   :  { %445 = vset.pattern.permute.xlu0 %v555_v7  ;;  %447 = vset.pattern.permute.xlu1 %v556_v8 }
  0x2a   :  { %82 = vperm.xlu0 %445, %v609_v2   ;;  %102 = vperm.xlu1 %447, %v609_v2  }
  0x2e   :  { %448 = vset.pattern.permute.xlu0 %v557_v9  ;;  %455 = vset.pattern.permute.xlu1 %v558_v10 }
  0x2f   :  { %120 = vperm.xlu0 %448, %v609_v2  }
  0x33   :  { %449 = vset.pattern.permute.xlu0 %v559_v11 }
  0x34   :  { %125 = vperm.xlu0 %449, %v609_v2  }
  0x38   :  { %450 = vset.pattern.permute.xlu0 %v560_v12 }
  0x39   :  { %135 = vperm.xlu0 %450, %v609_v2  }
  0x3d   :  { %451 = vset.pattern.permute.xlu0 %v561_v13 }
  0x3e   :  { %145 = vperm.xlu0 %451, %v609_v2  }
  0x42   :  { %452 = vset.pattern.permute.xlu0 %v562_v14  ;;  %v669_v14 = vld [vmem:[#allocation2 + $0x14] sm:$0xf] }
  0x43   :  { %156 = vperm.xlu0 %452, %v609_v2  }
  0x47   :  { %453 = vset.pattern.permute.xlu0 %v563_v15 }
  0x48   :  { %162 = vperm.xlu0 %453, %v609_v2  }
  0x4c   :  { %355 = vrot.lane.b32.xlu0 %v609_v2, %s564_s0 }
  0x4d   :  { %454 = vset.pattern.permute.xlu0 %v565_v17 }
  0x4e   :  { %113 = vadd.xlane.f32.xlu1 %v112_v16 }
  0x50   :  { %207 = vperm.xlu0 %454, %v609_v2  }
  0x54   :  { %457 = vset.pattern.permute.xlu0 %v566_v18  ;;  %v674_v18 = vld [vmem:[#allocation2 + $0x1c] sm:$0xf] }
  0x55   :  { %299 = vperm.xlu0 %457, %v609_v2  }
  0x59   :  { %460 = vset.pattern.permute.xlu0 %v567_v19  ;;  %v676_v19 = vld [vmem:[#allocation2 + $0x10] sm:$0xf] }
  0x5a   :  { %244 = vperm.xlu0 %460, %v609_v2  }
  0x5e   :  { %463 = vset.pattern.permute.xlu0 %v568_v20  ;;  %v585_v20 = vmov 20  }
  0x5f   :  { %191 = vrot.lane.b32.xlu1 %v609_v2, %s569_s1  ;;  %254 = vperm.xlu0 %463, %v609_v2  }
  0x63   :  { %273 = vrot.lane.b32.xlu1 %v609_v2, %s570_s19  ;;  %466 = vset.pattern.permute.xlu0 %v571_v21 }
  0x64   :  { %264 = vperm.xlu0 %466, %v609_v2  }
  0x67   :  { %289 = vperm.xlu1 %455, %v609_v2  }
  0x68   :  { %469 = vset.pattern.permute.xlu0 %v579_v29  ;;  %v686_v29 = vld [vmem:[#allocation2 + $0x18] sm:$0xf] }
  0x6b   :  { %456 = vset.pattern.permute.xlu1 %v572_v22 }
  0x6c   :  { %217 = vperm.xlu1 %456, %v609_v2  }
  0x70   :  { %458 = vset.pattern.permute.xlu1 %v573_v23 }
  0x71   :  { %227 = vperm.xlu1 %458, %v609_v2  }
  0x75   :  { %459 = vset.pattern.permute.xlu1 %v574_v24 }
  0x76   :  { %309 = vperm.xlu1 %459, %v609_v2  }
  0x7a   :  { %461 = vset.pattern.permute.xlu1 %v575_v25 }
  0x7b   :  { %172 = vperm.xlu1 %461, %v609_v2  }
  0x7f   :  { %462 = vset.pattern.permute.xlu1 %v576_v26  ;;  %v586_v26 = vmov 28  }
  0x80   :  { %326 = vperm.xlu1 %462, %v609_v2  }
  0x84   :  { %464 = vset.pattern.permute.xlu1 %v577_v27 }
  0x85   :  { %182 = vperm.xlu1 %464, %v609_v2  }
  0x89   :  { %465 = vset.pattern.permute.xlu1 %v578_v28 }
  0x8a   :  { %336 = vperm.xlu1 %465, %v609_v2  }
  0x8e   :  { %467 = vset.pattern.permute.xlu1 %v580_v30 }
  0x8f   :  { %346 = vperm.xlu1 %467, %v609_v2  }
  0x93   :  { %468 = vset.pattern.permute.xlu1 %v581_v31 }
  0x96   :  { %v41_v33 = vpop.permute.xlu0 %40  ;;  %v56_v34 = vpop.permute.xlu1 %55 }
  0x97   :  { %v645_v35 = vmul.f32 %v41_v33, %v37_v32  ;;  %v58_v41 = vmul.f32 %v56_v34, %v37_v32 }
  0x9b   :  { %v46_v36 = vpop.permute.xlu0 %45  ;;  %v77_v38 = vpop.permute.xlu1 %76 }
  0x9c   :  { %v48_v39 = vmul.f32 %v46_v36, %v37_v32  ;;  %v647_v40 = vmul.f32 %v77_v38, %v74_v37 }
  0x9e   :  { %50 = vrot.lane.b32.xlu1 %v48_v39, %s582_s20 }
  0xa0   :  { %v66_v42 = vpop.permute.xlu0 %65  ;;  %v93_v43 = vpop.permute.xlu1 %92 }
  0xa1   :  { %v95_v44 = vmul.f32 %v93_v43, %v74_v37  ;;  %v68_v45 = vmul.f32 %v66_v42, %v37_v32 }
  0xa2   :  { %60 = vrot.lane.b32.xlu1 %v58_v41, %s583_s21 }
  0xa3   :  { %97 = vrot.lane.b32.xlu0 %v95_v44, %s583_s21 }
  0xa5   :  { %v83_v46 = vpop.permute.xlu0 %82  ;;  %v103_v47 = vpop.permute.xlu1 %102 }
  0xa6   :  { %70 = vrot.lane.b32.xlu1 %v68_v45, %s584_s22  ;;  %v105_v48 = vmul.f32 %v103_v47, %v74_v37  ;;  %v85_v49 = vmul.f32 %v83_v46, %v74_v37 }
  0xa8   :  { %107 = vrot.lane.b32.xlu0 %v105_v48, %s584_s22 }
  0xaa   :  { %v121_v51 = vpop.permute.xlu0 %120  ;;  %87 = vrot.lane.b32.xlu1 %v85_v49, %s582_s20 }
  0xab   :  { %v655_v52 = vmul.f32 %v121_v51, %v118_v50 }
  0xaf   :  { %v126_v53 = vpop.permute.xlu0 %125 }
  0xb0   :  { %v128_v54 = vmul.f32 %v126_v53, %v118_v50 }
  0xb2   :  { %130 = vrot.lane.b32.xlu0 %v128_v54, %s582_s20 }
  0xb4   :  { %v136_v55 = vpop.permute.xlu0 %135 }
  0xb5   :  { %v138_v56 = vmul.f32 %v136_v55, %v118_v50 }
  0xb7   :  { %140 = vrot.lane.b32.xlu0 %v138_v56, %s583_s21 }
  0xb9   :  { %v146_v57 = vpop.permute.xlu0 %145 }
  0xba   :  { %v148_v58 = vmul.f32 %v146_v57, %v118_v50 }
  0xbc   :  { %150 = vrot.lane.b32.xlu1 %v148_v58, %s584_s22 }
  0xbe   :  { %v660_v59 = vpop.permute.xlu0 %156 }
  0xc3   :  { %v163_v61 = vpop.permute.xlu0 %162 }
  0xc4   :  { %v165_v62 = vmul.f32 %v163_v61, %v662_v60 }
  0xc6   :  { %167 = vrot.lane.b32.xlu1 %v165_v62, %s582_s20 }
  0xc7   :  { %v356_v3 = vpop.permute.xlu0 %355 }
  0xc8   :  { %v358_v5 = vsel %vm111_vm0, %v356_v3, 0.0 }
  0xcb   :  { %v208_v10 = vpop.permute.xlu0 %207 }
  0xcc   :  { %v210_v22 = vmul.f32 %v208_v10, %v676_v19 }
  0xd0   :  { %v300_v12 = vpop.permute.xlu0 %299 }
  0xd1   :  { %v302_v34 = vmul.f32 %v300_v12, %v686_v29 }
  0xd5   :  { %v245_v15 = vpop.permute.xlu0 %244 }
  0xd6   :  { %v247_v17 = vmul.f32 %v245_v15, %v669_v14 }
  0xd7   :  { %v114_v63 = vpop.xlane.xlu1 %113 }
  0xd8   :  { %v115_v37 = vadd.f32 1e-10, %v114_v63 }
  0xda   :  { %v255_v24 = vpop.permute.xlu0 %254  ;;  %473 = vrcp.f32 %v115_v37 }
  0xdb   :  { %v192_v0 = vpop.permute.xlu1 %191  ;;  %v257_v51 = vmul.f32 %v255_v24, %v669_v14 }
  0xdc   :  { %v194_v7 = vsel %vm111_vm0, %v192_v0, 0.0  ;;  %v159_v0 = vmul.f32 %v660_v59, %v662_v60 }
  0xdf   :  { %v274_v1 = vpop.permute.xlu1 %273  ;;  %v265_v28 = vpop.permute.xlu0 %264 }
  0xe0   :  { %v276_v4 = vsel %vm111_vm0, %v274_v1, 0.0  ;;  %v267_v31 = vmul.f32 %v265_v28, %v669_v14 }
  0xe1   :  { %277 = vadd.xlane.f32.xlu0 %v276_v4 }
  0xe3   :  { %v290_v6 = vpop.permute.xlu1 %289 }
  0xe5   :  { %359 = vadd.xlane.f32.xlu0 %v358_v5 }
  0xe7   :  { %v218_v8 = vpop.permute.xlu1 %217  ;;  %v474_v54 = vpop.eup %473 }
  0xe8   :  { %v220_v33 = vmul.f32 %v218_v8, %v676_v19 }
  0xea   :  { %195 = vadd.xlane.f32.xlu1 %v194_v7 }
  0xec   :  { %v228_v9 = vpop.permute.xlu1 %227 }
  0xed   :  { %v230_v41 = vmul.f32 %v228_v9, %v676_v19 }
  0xf1   :  { %v310_v11 = vpop.permute.xlu1 %309 }
  0xf2   :  { %v312_v45 = vmul.f32 %v310_v11, %v686_v29 }
  0xf6   :  { %v173_v13 = vpop.permute.xlu1 %172 }
  0xf7   :  { %v175_v48 = vmul.f32 %v173_v13, %v662_v60 }
  0xfb   :  { %202 = vperm.xlu1 %468, %v609_v2   ;;  %v327_v16 = vpop.permute.xlu1 %326  ;;  %284 = vperm.xlu0 %469, %v609_v2  }
  0xfc   :  { %v329_v21 = vmul.f32 %v327_v16, %v674_v18 }
  0xff   :  { %470 = vset.pattern.permute.xlu1 %v585_v20  ;;  %249 = vrot.lane.b32.xlu0 %v247_v17, %s582_s20 }
 0x100   :  { %238 = vperm.xlu1 %470, %v609_v2   ;;  %v183_v23 = vpop.permute.xlu1 %182  ;;  %472 = vset.pattern.permute.xlu0 %v580_v30  ;;  %v292_v30 = vmul.f32 %v290_v6, %v686_v29 }
 0x101   :  { %v185_v25 = vmul.f32 %v183_v23, %v662_v60 }
 0x103   :  { %331 = vrot.lane.b32.xlu0 %v329_v21, %s582_s20 }
 0x104   :  { %212 = vrot.lane.b32.xlu1 %v210_v22, %s582_s20 }
 0x105   :  { %471 = vset.pattern.permute.xlu1 %v586_v26  ;;  %v337_v27 = vpop.permute.xlu1 %336 }
 0x106   :  { %v339_v56 = vmul.f32 %v337_v27, %v674_v18 }
 0x107   :  { %187 = vrot.lane.b32.xlu0 %v185_v25, %s584_s22 }
 0x108   :  { %320 = vperm.xlu1 %471, %v609_v2  }
 0x10a   :  { %v347_v32 = vpop.permute.xlu1 %346 }
 0x10b   :  { %269 = vrot.lane.b32.xlu0 %v267_v31, %s584_s22 }
 0x10c   :  { %294 = vrot.lane.b32.xlu1 %v292_v30, %s582_s20 }
 0x110   :  { %222 = vrot.lane.b32.xlu1 %v220_v33, %s583_s21  ;;  %v51_v36 = vpop.permute.xlu1 %50 }
 0x111   :  { %v53_v38 = vadd.f32 %v51_v36, %v645_v35 }
 0x114   :  { %304 = vrot.lane.b32.xlu1 %v302_v34, %s583_s21  ;;  %v61_v2 = vpop.permute.xlu1 %60 }
 0x115   :  { %v63_v39 = vadd.f32 %v61_v2, %v53_v38  ;;  %v98_v43 = vpop.permute.xlu0 %97 }
 0x118   :  { %232 = vrot.lane.b32.xlu1 %v230_v41, %s584_s22  ;;  %v71_v42 = vpop.permute.xlu1 %70 }
 0x119   :  { %v73_v44 = vadd.f32 %v71_v42, %v63_v39 }
 0x11a   :  { %v108_v49 = vpop.permute.xlu0 %107 }
 0x11b   :  { %v80_v46 = vadd.f32 %v647_v40, %v73_v44  ;;  %v349_v40 = vmul.f32 %v347_v32, %v674_v18 }
 0x11c   :  { %314 = vrot.lane.b32.xlu1 %v312_v45, %s584_s22  ;;  %v88_v47 = vpop.permute.xlu1 %87 }
 0x11d   :  { %v90_v35 = vadd.f32 %v88_v47, %v80_v46 }
 0x11f   :  { %v100_v50 = vadd.f32 %v98_v43, %v90_v35 }
 0x120   :  { %177 = vrot.lane.b32.xlu1 %v175_v48, %s583_s21 }
 0x121   :  { %v110_v53 = vadd.f32 %v108_v49, %v100_v50 }
 0x123   :  { %v707_v55 = vmul.f32 %v474_v54, %v110_v53 }
 0x124   :  { %v131_v57 = vpop.permute.xlu0 %130  ;;  %259 = vrot.lane.b32.xlu1 %v257_v51, %s583_s21 }
 0x125   :  { %v133_v61 = vadd.f32 %v131_v57, %v655_v52 }
 0x128   :  { %341 = vrot.lane.b32.xlu1 %v339_v56, %s583_s21 }
 0x129   :  { %v141_v58 = vpop.permute.xlu0 %140 }
 0x12a   :  { %v143_v62 = vadd.f32 %v141_v58, %v133_v61 }
 0x12c   :  { %351 = vrot.lane.b32.xlu1 %v349_v40, %s584_s22 }
 0x12e   :  { %v151_v63 = vpop.permute.xlu1 %150 }
 0x12f   :  { %v153_v1 = vadd.f32 %v151_v63, %v143_v62 }
 0x131   :  { %v160_v3 = vadd.f32 %v159_v0, %v153_v1 }
 0x138   :  { %v168_v4 = vpop.permute.xlu1 %167 }
 0x139   :  { %v170_v30 = vadd.f32 %v168_v4, %v160_v3 }
 0x16a   :  { %v278_v9 = vpop.xlane.xlu0 %277 }
 0x16b   :  { %v279_v59 = vadd.f32 1e-10, %v278_v9 }
 0x16e   :  { %v360_v11 = vpop.xlane.xlu0 %359 }
 0x16f   :  { %v361_v28 = vadd.f32 1e-10, %v360_v11 }
 0x173   :  { %v196_v5 = vpop.xlane.xlu1 %195 }
 0x174   :  { %v197_v15 = vadd.f32 1e-10, %v196_v5 }
 0x176   :  { %v285_v13 = vpop.permute.xlu0 %284  ;;  %475 = vrcp.f32 %v197_v15 }
 0x177   :  { %v203_v6 = vpop.permute.xlu1 %202  ;;  %v287_v22 = vmul.f32 %v285_v13, %v686_v29  ;;  %477 = vrcp.f32 %v279_v59 }
 0x178   :  { %v205_v20 = vmul.f32 %v203_v6, %v676_v19  ;;  %479 = vrcp.f32 %v361_v28 }
 0x17a   :  { %v250_v16 = vpop.permute.xlu0 %249 }
 0x17b   :  { %v239_v7 = vpop.permute.xlu1 %238 }
 0x17c   :  { %v241_v27 = vmul.f32 %v239_v7, %v669_v14 }
 0x17e   :  { %v332_v24 = vpop.permute.xlu0 %331 }
 0x17f   :  { %v213_v8 = vpop.permute.xlu1 %212 }
 0x180   :  { %v215_v60 = vadd.f32 %v213_v8, %v205_v20 }
 0x182   :  { %v188_v34 = vpop.permute.xlu0 %187 }
 0x183   :  { %v321_v10 = vpop.permute.xlu1 %320  ;;  %v476_v39 = vpop.eup %475 }
 0x184   :  { %v323_v38 = vmul.f32 %v321_v10, %v674_v18  ;;  %v478_v46 = vpop.eup %477 }
 0x185   :  { %v480_v51 = vpop.eup %479 }
 0x186   :  { %v270_v42 = vpop.permute.xlu0 %269 }
 0x187   :  { %v295_v12 = vpop.permute.xlu1 %294 }
 0x188   :  { %v297_v31 = vadd.f32 %v295_v12, %v287_v22 }
 0x18b   :  { %v223_v52 = vpop.permute.xlu1 %222 }
 0x18c   :  { %v225_v23 = vadd.f32 %v223_v52, %v215_v60 }
 0x18f   :  { %v305_v17 = vpop.permute.xlu1 %304 }
 0x190   :  { %v307_v32 = vadd.f32 %v305_v17, %v297_v31 }
 0x193   :  { %v233_v21 = vpop.permute.xlu1 %232 }
 0x194   :  { %v235_v25 = vadd.f32 %v233_v21, %v225_v23 }
 0x196   :  { %v242_v33 = vadd.f32 %v241_v27, %v235_v25 }
 0x197   :  { %v315_v26 = vpop.permute.xlu1 %314 }
 0x198   :  { %v317_v36 = vadd.f32 %v315_v26, %v307_v32  ;;  %v252_v2 = vadd.f32 %v250_v16, %v242_v33 }
 0x19a   :  { %v324_v43 = vadd.f32 %v323_v38, %v317_v36 }
 0x19b   :  { %v178_v19 = vpop.permute.xlu1 %177 }
 0x19c   :  { %v180_v37 = vadd.f32 %v178_v19, %v170_v30  ;;  %v334_v48 = vadd.f32 %v332_v24, %v324_v43 }
 0x19e   :  { %v190_v29 = vadd.f32 %v188_v34, %v180_v37 }
 0x19f   :  { %v260_v41 = vpop.permute.xlu1 %259 }
 0x1a0   :  { %v262_v44 = vadd.f32 %v260_v41, %v252_v2  ;;  %v199_v14 = vmul.f32 %v476_v39, %v190_v29 }
 0x1a2   :  { %v272_v45 = vadd.f32 %v270_v42, %v262_v44  ;;  %365 = vrot.lane.b32.xlu0 %v199_v14, %s584_s22 }
 0x1a3   :  { %v342_v47 = vpop.permute.xlu1 %341 }
 0x1a4   :  { %v281_v35 = vmul.f32 %v478_v46, %v272_v45  ;;  %v344_v49 = vadd.f32 %v342_v47, %v334_v48 }
 0x1a6   :  { %369 = vrot.lane.b32.xlu1 %v281_v35, %s583_s21 }
 0x1a7   :  { %v352_v50 = vpop.permute.xlu1 %351 }
 0x1a8   :  { %v354_v18 = vadd.f32 %v352_v50, %v344_v49 }
 0x1aa   :  { %v363_v53 = vmul.f32 %v480_v51, %v354_v18 }
 0x1ac   :  { %373 = vrot.lane.b32.xlu0 %v363_v53, %s582_s20 }
 0x214   :  { %v366_v54 = vpop.permute.xlu0 %365 }
 0x215   :  { %v377_v57 = vsel %vm376_vm1, %v707_v55, %v366_v54 }
 0x218   :  { %v370_v56 = vpop.permute.xlu1 %369 }
 0x219   :  { %v379_v40 = vsel %vm378_vm2, %v377_v57, %v370_v56 }
 0x21e   :  { %v374_v58 = vpop.permute.xlu0 %373 }
 0x21f   :  { %v381_v61 = vsel %vm380_vm3, %v379_v40, %v374_v58 }
 0x220   :  { %382 = vst [vmem:[#allocation7] sm:$0xf] %v381_v61 }
 0x221   :  { %532 = shalt.err (!%p529_p0)
}
 0x222   :  { %392 = dma.vmem_to_hbm [thread:$0]  %s390_s24, 64, %s730_s2, [#allocation4]  }
 0x223   :  { %545 = dma.done.wait [#allocation4], 64  }
 0x224   :  { %546 = vsyncadd [#allocation4], 4294967232 }
 0x225   :  { %396 = vsyncpa [#allocation3], 1 }
 0x226   :  { %397 = vsyncpa [#allocation6], 1 }
 0x227   :  { %398 = vsyncpa [#allocation4], 1 }

</bundles_post_ra>
